<compile_context>
chip_gen: v7x
topology: tpu7x:2x2x1
jax: 0.10.0
libtpu: 0.0.40
codegen_flags: <defaults>
</compile_context>

<pallas_src>
import functools
import math

import jax
import jax.numpy as jnp
from jax import lax
from jax.experimental import pallas as pl
from jax.experimental.pallas import tpu as pltpu


def _mhca_kernel(x_ref, enc_ref, wq_ref, wk_ref, wv_ref, wo_ref, o_ref,
                 k_scr, v_scr, concat_scr, *, num_heads, d_k, mxu_dtype):
    # x_ref: (1, Tq, D)  enc_ref: (1, S, D)  w*_ref: (D, D)  o_ref: (1, Tq, D)
    # k_scr / v_scr: (S, D) in mxu_dtype (persist across q-tiles of one batch)
    # concat_scr: (Tq, D) f32 (lane-dense per-head PV results)
    dn = (((1,), (1,)), ((), ()))  # y = a @ b.T  (weights are (out, in) like nn.Linear)

    # --- K/V projections once per batch (first q-tile only), cached in VMEM scratch ---
    @pl.when(pl.program_id(1) == 0)
    def _():
        enc = enc_ref[0]                                                     # (S, D)
        k = lax.dot_general(enc, wk_ref[...], dn, preferred_element_type=jnp.float32)
        v = lax.dot_general(enc, wv_ref[...], dn, preferred_element_type=jnp.float32)
        k_scr[...] = k.astype(k_scr.dtype)                                   # cast once
        v_scr[...] = v.astype(v_scr.dtype)

    # --- Q projection for this q-tile, all heads at once (MXU N-dim = D, not d_k) ---
    x = x_ref[0]                                                             # (Tq, D)
    q = lax.dot_general(x, wq_ref[...], dn, preferred_element_type=jnp.float32)
    # Fold 1/sqrt(d_k) into Q (scales (Tq, D) once, not every (Tq, S) score tile), cast once.
    q = (q * jnp.float32(1.0 / math.sqrt(d_k))).astype(mxu_dtype)            # (Tq, D)

    k = k_scr[...]                                                           # (S, D) mxu_dtype
    v = v_scr[...]                                                           # (S, D) mxu_dtype

    # --- per-head attention; results written lane-dense into concat scratch ---
    for h in range(num_heads):
        lo = h * d_k
        qh = q[:, lo:lo + d_k]                                               # (Tq, d_k)
        kh = k[:, lo:lo + d_k]                                               # (S,  d_k)
        vh = v[:, lo:lo + d_k]                                               # (S,  d_k)

        scores = lax.dot_general(qh, kh, dn, preferred_element_type=jnp.float32)  # (Tq, S) f32

        # Numerically-stable softmax in f32; normalization deferred until after the PV matmul
        # so the divide touches (Tq, d_k) instead of (Tq, S).
        m = jnp.max(scores, axis=-1, keepdims=True)
        p = jnp.exp(scores - m)                                              # (Tq, S) f32
        denom = jnp.sum(p, axis=-1, keepdims=True)                           # (Tq, 1) f32

        pv = jnp.dot(p.astype(mxu_dtype), vh, preferred_element_type=jnp.float32)  # (Tq, d_k)
        concat_scr[:, lo:lo + d_k] = pv * pl.reciprocal(denom, approx=True)

    # --- fused output projection: out = concat @ W_o.T ---
    concat = concat_scr[...].astype(mxu_dtype)                               # (Tq, D)
    out = lax.dot_general(concat, wo_ref[...], dn, preferred_element_type=jnp.float32)
    o_ref[0] = out.astype(o_ref.dtype)


def _vmem_capacity_bytes():
    try:
        return int(pltpu.get_tpu_info().vmem_capacity_bytes)
    except Exception:
        return 64 << 20  # conservative (v7x per-TC)


def _pick_q_tile(S, D, in_itemsize, out_itemsize, kv_itemsize, vmem_cap):
    """Budget-driven q-tile: largest multiple-of-8 divisor of S whose working set fits VMEM."""
    budget = int(vmem_cap * 0.7)
    # Resident regardless of q_tile: double-buffered weights + enc block, K/V scratch.
    fixed = 2 * 4 * D * D * in_itemsize + 2 * S * D * in_itemsize + 2 * S * D * kv_itemsize
    # Per q-row: x/out blocks (double-buffered), concat scratch (f32), ~2 (row, S) f32 temps.
    per_row = 2 * D * in_itemsize + 2 * D * out_itemsize + 4 * D + 2 * 4 * S
    max_rows = max((budget - fixed) // per_row, 8)
    cands = [t for t in range(8, S + 1, 8) if S % t == 0]
    if not cands:
        return S  # tiny / odd S: take it whole
    fitting = [t for t in cands if t <= min(max_rows, 512)]
    if fitting:
        return max(fitting)
    return min(cands)  # over budget even at the smallest tile -> see flash-tiling TODO above


def multi_cross_attention(x, encoder_output, w_q, w_k, w_v, w_o, num_heads,
                          *, compute_dtype=jnp.bfloat16, q_tile=None,
                          single_buffer_weights=False):
    """Forward pass of MultiCrossAttention.  Weights are (out_features, in_features), no bias.

    compute_dtype: MXU operand dtype (default bf16; softmax/accumulation always f32).
    single_buffer_weights: use pipeline_mode=pl.Buffered(1) for the constant (D, D) weights —
      enable on v7x with large d_model to halve the weight VMEM reservation.
    """
    B, S, D = x.shape
    assert D % num_heads == 0
    d_k = D // num_heads
    out_dtype = x.dtype

    mxu_dtype = compute_dtype if compute_dtype is not None else jnp.float32
    if compute_dtype is not None:
        # Cast once at the boundary: halves HBM->VMEM DMA bytes (v5e BW) and weight VMEM (v7x).
        x_in = x.astype(compute_dtype)
        enc_in = encoder_output.astype(compute_dtype)
        w_q, w_k, w_v, w_o = (w.astype(compute_dtype) for w in (w_q, w_k, w_v, w_o))
    else:
        x_in, enc_in = x, encoder_output

    in_itemsize = jnp.dtype(x_in.dtype).itemsize
    out_itemsize = jnp.dtype(out_dtype).itemsize
    kv_itemsize = jnp.dtype(mxu_dtype).itemsize
    vmem_cap = _vmem_capacity_bytes()

    if q_tile is None:
        q_tile = _pick_q_tile(S, D, in_itemsize, out_itemsize, kv_itemsize, vmem_cap)
    assert S % q_tile == 0
    assert q_tile % 8 == 0 or q_tile == S
    n_q_tiles = S // q_tile

    # Explicit scoped-VMEM limit from the actual block/scratch sizes (+headroom), capped to HW.
    need = (2 * 4 * D * D * in_itemsize            # weights (double-buffered)
            + 2 * q_tile * D * in_itemsize         # x block
            + 2 * S * D * in_itemsize              # encoder block
            + 2 * q_tile * D * out_itemsize        # output block
            + 2 * S * D * kv_itemsize              # K/V scratch
            + q_tile * D * 4                       # concat scratch (f32)
            + 2 * q_tile * S * 4)                  # score + exp temporaries (f32)
    vmem_limit = int(min(max(int(need * 1.5) + (2 << 20), 32 << 20), vmem_cap - (4 << 20)))

    # Advisory cost estimate for the XLA scheduler.
    flops = 8 * B * S * D * D + 4 * B * S * S * D
    transcendentals = B * num_heads * S * S
    bytes_accessed = (2 * B * S * D + 4 * D * D) * in_itemsize + B * S * D * out_itemsize
    cost = pl.CostEstimate(flops=flops, transcendentals=transcendentals,
                           bytes_accessed=bytes_accessed)

    weight_spec_kwargs = {}
    if single_buffer_weights:
        weight_spec_kwargs = dict(pipeline_mode=pl.Buffered(1))  # constant index_map: 1 buffer

    kernel = functools.partial(_mhca_kernel, num_heads=num_heads, d_k=d_k,
                               mxu_dtype=mxu_dtype)

    out = pl.pallas_call(
        kernel,
        out_shape=jax.ShapeDtypeStruct((B, S, D), out_dtype),
        grid_spec=pltpu.PrefetchScalarGridSpec(
            num_scalar_prefetch=0,
            grid=(B, n_q_tiles),
            in_specs=[
                pl.BlockSpec((1, q_tile, D), lambda b, t: (b, t, 0)),   # x (query tile)
                pl.BlockSpec((1, S, D),      lambda b, t: (b, 0, 0)),   # encoder_output (full S)
                pl.BlockSpec((D, D), lambda b, t: (0, 0), **weight_spec_kwargs),  # W_q
                pl.BlockSpec((D, D), lambda b, t: (0, 0), **weight_spec_kwargs),  # W_k
                pl.BlockSpec((D, D), lambda b, t: (0, 0), **weight_spec_kwargs),  # W_v
                pl.BlockSpec((D, D), lambda b, t: (0, 0), **weight_spec_kwargs),  # W_o
            ],
            out_specs=pl.BlockSpec((1, q_tile, D), lambda b, t: (b, t, 0)),
            scratch_shapes=[
                pltpu.VMEM((S, D), mxu_dtype),        # K cache (per batch, across q-tiles)
                pltpu.VMEM((S, D), mxu_dtype),        # V cache
                pltpu.VMEM((q_tile, D), jnp.float32), # lane-dense head-concat accumulator
            ],
        ),
        compiler_params=pltpu.CompilerParams(
            # B parallel (megacore shards batches); q-tile axis arbitrary so the per-batch
            # K/V scratch computed at t==0 is valid for all later q-tiles of that batch.
            dimension_semantics=("parallel", "arbitrary"),
            vmem_limit_bytes=vmem_limit,
        ),
        cost_estimate=cost,
    )(x_in, enc_in, w_q, w_k, w_v, w_o)

    return out


def _reference(x, enc, w_q, w_k, w_v, w_o, num_heads):
    B, S, D = x.shape
    d_k = D // num_heads
    Q = (x @ w_q.T).reshape(B, S, num_heads, d_k).transpose(0, 2, 1, 3)
    K = (enc @ w_k.T).reshape(B, S, num_heads, d_k).transpose(0, 2, 1, 3)
    V = (enc @ w_v.T).reshape(B, S, num_heads, d_k).transpose(0, 2, 1, 3)
    scores = (Q @ jnp.swapaxes(K, -2, -1)) / (d_k ** 0.5)
    attn = jax.nn.softmax(scores, axis=-1)
    out = (attn @ V).transpose(0, 2, 1, 3).reshape(B, S, D)
    return out @ w_o.T


if __name__ == "__main__":
    # Small shapes consistent with the module's forward: d_model=32, num_heads=4 (d_k=8).
    B, S, D, H = 2, 8, 32, 4
    key = jax.random.PRNGKey(0)
    kx, ke, kq, kk, kv, ko = jax.random.split(key, 6)

    x = jax.random.normal(kx, (B, S, D), dtype=jnp.float32)
    encoder_output = jax.random.normal(ke, (B, S, D), dtype=jnp.float32)

    # nn.Linear-style init (bias=False): uniform(-1/sqrt(D), 1/sqrt(D)), shape (out, in).
    bound = 1.0 / math.sqrt(D)
    w_q = jax.random.uniform(kq, (D, D), jnp.float32, -bound, bound)
    w_k = jax.random.uniform(kk, (D, D), jnp.float32, -bound, bound)
    w_v = jax.random.uniform(kv, (D, D), jnp.float32, -bound, bound)
    w_o = jax.random.uniform(ko, (D, D), jnp.float32, -bound, bound)

    out = multi_cross_attention(x, encoder_output, w_q, w_k, w_v, w_o, H)
    out = jax.block_until_ready(out)

    ref = _reference(x, encoder_output, w_q, w_k, w_v, w_o, H)
    assert out.shape == (B, S, D)
    # Tolerance accounts for the default bf16 MXU operand path and the EUP approximate
    # reciprocal in the softmax normalization (softmax/accumulation are f32).
    assert jnp.allclose(out, ref, rtol=5e-2, atol=3e-2), "mismatch vs reference"

    print("KERNEL_OK")
</pallas_src>

<mosaic_0001>
module attributes {stable_mosaic.version = 11 : i64} {
  func.func @_mhca_kernel(%arg0: i32, %arg1: i32, %arg2: memref<1x8x32xbf16, #tpu.memory_space<vmem>>, %arg3: memref<1x8x32xbf16, #tpu.memory_space<vmem>>, %arg4: memref<32x32xbf16, #tpu.memory_space<vmem>>, %arg5: memref<32x32xbf16, #tpu.memory_space<vmem>>, %arg6: memref<32x32xbf16, #tpu.memory_space<vmem>>, %arg7: memref<32x32xbf16, #tpu.memory_space<vmem>>, %arg8: memref<1x8x32xf32, #tpu.memory_space<vmem>>, %arg9: memref<8x32xbf16, #tpu.memory_space<vmem>>, %arg10: memref<8x32xbf16, #tpu.memory_space<vmem>>, %arg11: memref<8x32xf32, #tpu.memory_space<vmem>>) attributes {dimension_semantics = [#tpu.dimension_semantics<parallel>, #tpu.dimension_semantics<arbitrary>], iteration_bounds = array<i64: 2, 1>, scalar_prefetch = 0 : i64, scratch_operands = 3 : i64, tpu.core_type = #tpu.core_type<tc>, window_params = [{transform_indices = @transform_0, window_bounds = array<i64: 1, 8, 32>}, {transform_indices = @transform_1, window_bounds = array<i64: 1, 8, 32>}, {pipeline_mode = #tpu.pipeline_mode<synchronous>, transform_indices = @transform_2, window_bounds = array<i64: 32, 32>}, {pipeline_mode = #tpu.pipeline_mode<synchronous>, transform_indices = @transform_3, window_bounds = array<i64: 32, 32>}, {pipeline_mode = #tpu.pipeline_mode<synchronous>, transform_indices = @transform_4, window_bounds = array<i64: 32, 32>}, {pipeline_mode = #tpu.pipeline_mode<synchronous>, transform_indices = @transform_5, window_bounds = array<i64: 32, 32>}, {transform_indices = @transform_6, window_bounds = array<i64: 1, 8, 32>}]} {
    %c0_i32 = arith.constant 0 : i32
    %0 = arith.cmpi eq, %arg1, %c0_i32 : i32
    %1 = arith.extui %0 : i1 to i32
    %c0_i32_0 = arith.constant 0 : i32
    %2 = arith.cmpi ne, %1, %c0_i32_0 : i32
    scf.if %2 {
      %c0_39 = arith.constant 0 : index
      %c0_40 = arith.constant 0 : index
      %c0_41 = arith.constant 0 : index
      %87 = vector.load %arg3[%c0_39, %c0_40, %c0_41] : memref<1x8x32xbf16, #tpu.memory_space<vmem>>, vector<1x8x32xbf16>
      %88 = vector.shape_cast %87 : vector<1x8x32xbf16> to vector<8x32xbf16>
      %c0_42 = arith.constant 0 : index
      %c0_43 = arith.constant 0 : index
      %89 = vector.load %arg5[%c0_42, %c0_43] : memref<32x32xbf16, #tpu.memory_space<vmem>>, vector<32x32xbf16>
      %cst_44 = arith.constant dense<0.000000e+00> : vector<8x32xf32>
      %90 = tpu.matmul %88, %89, %cst_44 {dimension_numbers = #tpu.dot_dimension_numbers<[1], [1], [0], [0], [0, 0, 1, 0], [], []>} : vector<8x32xbf16>, vector<32x32xbf16>, vector<8x32xf32> -> vector<8x32xf32>
      %c0_45 = arith.constant 0 : index
      %c0_46 = arith.constant 0 : index
      %91 = vector.load %arg6[%c0_45, %c0_46] : memref<32x32xbf16, #tpu.memory_space<vmem>>, vector<32x32xbf16>
      %cst_47 = arith.constant dense<0.000000e+00> : vector<8x32xf32>
      %92 = tpu.matmul %88, %91, %cst_47 {dimension_numbers = #tpu.dot_dimension_numbers<[1], [1], [0], [0], [0, 0, 1, 0], [], []>} : vector<8x32xbf16>, vector<32x32xbf16>, vector<8x32xf32> -> vector<8x32xf32>
      %93 = arith.truncf %90 : vector<8x32xf32> to vector<8x32xbf16>
      %c0_48 = arith.constant 0 : index
      %c0_49 = arith.constant 0 : index
      %94 = vector.load %arg9[%c0_48, %c0_49] : memref<8x32xbf16, #tpu.memory_space<vmem>>, vector<8x32xbf16>
      tpu.vector_store %arg9[%c0_48, %c0_49], %93 {strides = array<i32>} : memref<8x32xbf16, #tpu.memory_space<vmem>>, vector<8x32xbf16>,
      %95 = arith.truncf %92 : vector<8x32xf32> to vector<8x32xbf16>
      %c0_50 = arith.constant 0 : index
      %c0_51 = arith.constant 0 : index
      %96 = vector.load %arg10[%c0_50, %c0_51] : memref<8x32xbf16, #tpu.memory_space<vmem>>, vector<8x32xbf16>
      tpu.vector_store %arg10[%c0_50, %c0_51], %95 {strides = array<i32>} : memref<8x32xbf16, #tpu.memory_space<vmem>>, vector<8x32xbf16>,
    } else {
    }
    %c0 = arith.constant 0 : index
    %c0_1 = arith.constant 0 : index
    %c0_2 = arith.constant 0 : index
    %3 = vector.load %arg2[%c0, %c0_1, %c0_2] : memref<1x8x32xbf16, #tpu.memory_space<vmem>>, vector<1x8x32xbf16>
    %4 = vector.shape_cast %3 : vector<1x8x32xbf16> to vector<8x32xbf16>
    %c0_3 = arith.constant 0 : index
    %c0_4 = arith.constant 0 : index
    %5 = vector.load %arg4[%c0_3, %c0_4] : memref<32x32xbf16, #tpu.memory_space<vmem>>, vector<32x32xbf16>
    %cst = arith.constant dense<0.000000e+00> : vector<8x32xf32>
    %6 = tpu.matmul %4, %5, %cst {dimension_numbers = #tpu.dot_dimension_numbers<[1], [1], [0], [0], [0, 0, 1, 0], [], []>} : vector<8x32xbf16>, vector<32x32xbf16>, vector<8x32xf32> -> vector<8x32xf32>
    %cst_5 = arith.constant 0.353553385 : f32
    %7 = vector.broadcast %cst_5 : f32 to vector<8x32xf32>
    %8 = arith.mulf %6, %7 : vector<8x32xf32>
    %9 = arith.truncf %8 : vector<8x32xf32> to vector<8x32xbf16>
    %c0_6 = arith.constant 0 : index
    %c0_7 = arith.constant 0 : index
    %10 = vector.load %arg9[%c0_6, %c0_7] : memref<8x32xbf16, #tpu.memory_space<vmem>>, vector<8x32xbf16>
    %c0_8 = arith.constant 0 : index
    %c0_9 = arith.constant 0 : index
    %11 = vector.load %arg10[%c0_8, %c0_9] : memref<8x32xbf16, #tpu.memory_space<vmem>>, vector<8x32xbf16>
    %12 = vector.extract_strided_slice %9 {offsets = [0, 0], sizes = [8, 8], strides = [1, 1]} : vector<8x32xbf16> to vector<8x8xbf16>
    %13 = vector.extract_strided_slice %10 {offsets = [0, 0], sizes = [8, 8], strides = [1, 1]} : vector<8x32xbf16> to vector<8x8xbf16>
    %14 = vector.extract_strided_slice %11 {offsets = [0, 0], sizes = [8, 8], strides = [1, 1]} : vector<8x32xbf16> to vector<8x8xbf16>
    %cst_10 = arith.constant dense<0.000000e+00> : vector<8x8xf32>
    %15 = tpu.matmul %12, %13, %cst_10 {dimension_numbers = #tpu.dot_dimension_numbers<[1], [1], [0], [0], [0, 0, 1, 0], [], []>} : vector<8x8xbf16>, vector<8x8xbf16>, vector<8x8xf32> -> vector<8x8xf32>
    %cst_11 = arith.constant dense<0xFF800000> : vector<8xf32>
    %16 = vector.multi_reduction <maximumf>, %15, %cst_11 [1] : vector<8x8xf32> to vector<8xf32>
    %17 = vector.shape_cast %16 : vector<8xf32> to vector<8x1xf32>
    %18 = vector.broadcast %17 : vector<8x1xf32> to vector<8x8xf32>
    %19 = arith.subf %15, %18 : vector<8x8xf32>
    %20 = math.exp %19 : vector<8x8xf32>
    %cst_12 = arith.constant dense<0.000000e+00> : vector<8xf32>
    %21 = vector.multi_reduction <add>, %20, %cst_12 [1] : vector<8x8xf32> to vector<8xf32>
    %22 = vector.shape_cast %21 : vector<8xf32> to vector<8x1xf32>
    %23 = arith.truncf %20 : vector<8x8xf32> to vector<8x8xbf16>
    %cst_13 = arith.constant dense<0.000000e+00> : vector<8x8xf32>
    %24 = tpu.matmul %23, %14, %cst_13 {dimension_numbers = #tpu.dot_dimension_numbers<[1], [0], [0], [1], [0, 0, 1, 1], [], []>} : vector<8x8xbf16>, vector<8x8xbf16>, vector<8x8xf32> -> vector<8x8xf32>
    %25 = tpu.reciprocal %22 {approx = true} : vector<8x1xf32> -> vector<8x1xf32>
    %26 = vector.broadcast %25 : vector<8x1xf32> to vector<8x8xf32>
    %27 = arith.mulf %24, %26 : vector<8x8xf32>
    %c0_14 = arith.constant 0 : index
    %c0_15 = arith.constant 0 : index
    %28 = vector.load %arg11[%c0_14, %c0_15] : memref<8x32xf32, #tpu.memory_space<vmem>>, vector<8x8xf32>
    tpu.vector_store %arg11[%c0_14, %c0_15], %27 {strides = array<i32>} : memref<8x32xf32, #tpu.memory_space<vmem>>, vector<8x8xf32>,
    %29 = vector.extract_strided_slice %9 {offsets = [0, 8], sizes = [8, 8], strides = [1, 1]} : vector<8x32xbf16> to vector<8x8xbf16>
    %30 = vector.extract_strided_slice %10 {offsets = [0, 8], sizes = [8, 8], strides = [1, 1]} : vector<8x32xbf16> to vector<8x8xbf16>
    %31 = vector.extract_strided_slice %11 {offsets = [0, 8], sizes = [8, 8], strides = [1, 1]} : vector<8x32xbf16> to vector<8x8xbf16>
    %cst_16 = arith.constant dense<0.000000e+00> : vector<8x8xf32>
    %32 = tpu.matmul %29, %30, %cst_16 {dimension_numbers = #tpu.dot_dimension_numbers<[1], [1], [0], [0], [0, 0, 1, 0], [], []>} : vector<8x8xbf16>, vector<8x8xbf16>, vector<8x8xf32> -> vector<8x8xf32>
    %cst_17 = arith.constant dense<0xFF800000> : vector<8xf32>
    %33 = vector.multi_reduction <maximumf>, %32, %cst_17 [1] : vector<8x8xf32> to vector<8xf32>
    %34 = vector.shape_cast %33 : vector<8xf32> to vector<8x1xf32>
    %35 = vector.broadcast %34 : vector<8x1xf32> to vector<8x8xf32>
    %36 = arith.subf %32, %35 : vector<8x8xf32>
    %37 = math.exp %36 : vector<8x8xf32>
    %cst_18 = arith.constant dense<0.000000e+00> : vector<8xf32>
    %38 = vector.multi_reduction <add>, %37, %cst_18 [1] : vector<8x8xf32> to vector<8xf32>
    %39 = vector.shape_cast %38 : vector<8xf32> to vector<8x1xf32>
    %40 = arith.truncf %37 : vector<8x8xf32> to vector<8x8xbf16>
    %cst_19 = arith.constant dense<0.000000e+00> : vector<8x8xf32>
    %41 = tpu.matmul %40, %31, %cst_19 {dimension_numbers = #tpu.dot_dimension_numbers<[1], [0], [0], [1], [0, 0, 1, 1], [], []>} : vector<8x8xbf16>, vector<8x8xbf16>, vector<8x8xf32> -> vector<8x8xf32>
    %42 = tpu.reciprocal %39 {approx = true} : vector<8x1xf32> -> vector<8x1xf32>
    %43 = vector.broadcast %42 : vector<8x1xf32> to vector<8x8xf32>
    %44 = arith.mulf %41, %43 : vector<8x8xf32>
    %c0_20 = arith.constant 0 : index
    %c8 = arith.constant 8 : index
    %45 = vector.load %arg11[%c0_20, %c8] : memref<8x32xf32, #tpu.memory_space<vmem>>, vector<8x8xf32>
    tpu.vector_store %arg11[%c0_20, %c8], %44 {strides = array<i32>} : memref<8x32xf32, #tpu.memory_space<vmem>>, vector<8x8xf32>,
    %46 = vector.extract_strided_slice %9 {offsets = [0, 16], sizes = [8, 8], strides = [1, 1]} : vector<8x32xbf16> to vector<8x8xbf16>
    %47 = vector.extract_strided_slice %10 {offsets = [0, 16], sizes = [8, 8], strides = [1, 1]} : vector<8x32xbf16> to vector<8x8xbf16>
    %48 = vector.extract_strided_slice %11 {offsets = [0, 16], sizes = [8, 8], strides = [1, 1]} : vector<8x32xbf16> to vector<8x8xbf16>
    %cst_21 = arith.constant dense<0.000000e+00> : vector<8x8xf32>
    %49 = tpu.matmul %46, %47, %cst_21 {dimension_numbers = #tpu.dot_dimension_numbers<[1], [1], [0], [0], [0, 0, 1, 0], [], []>} : vector<8x8xbf16>, vector<8x8xbf16>, vector<8x8xf32> -> vector<8x8xf32>
    %cst_22 = arith.constant dense<0xFF800000> : vector<8xf32>
    %50 = vector.multi_reduction <maximumf>, %49, %cst_22 [1] : vector<8x8xf32> to vector<8xf32>
    %51 = vector.shape_cast %50 : vector<8xf32> to vector<8x1xf32>
    %52 = vector.broadcast %51 : vector<8x1xf32> to vector<8x8xf32>
    %53 = arith.subf %49, %52 : vector<8x8xf32>
    %54 = math.exp %53 : vector<8x8xf32>
    %cst_23 = arith.constant dense<0.000000e+00> : vector<8xf32>
    %55 = vector.multi_reduction <add>, %54, %cst_23 [1] : vector<8x8xf32> to vector<8xf32>
    %56 = vector.shape_cast %55 : vector<8xf32> to vector<8x1xf32>
    %57 = arith.truncf %54 : vector<8x8xf32> to vector<8x8xbf16>
    %cst_24 = arith.constant dense<0.000000e+00> : vector<8x8xf32>
    %58 = tpu.matmul %57, %48, %cst_24 {dimension_numbers = #tpu.dot_dimension_numbers<[1], [0], [0], [1], [0, 0, 1, 1], [], []>} : vector<8x8xbf16>, vector<8x8xbf16>, vector<8x8xf32> -> vector<8x8xf32>
    %59 = tpu.reciprocal %56 {approx = true} : vector<8x1xf32> -> vector<8x1xf32>
    %60 = vector.broadcast %59 : vector<8x1xf32> to vector<8x8xf32>
    %61 = arith.mulf %58, %60 : vector<8x8xf32>
    %c0_25 = arith.constant 0 : index
    %c16 = arith.constant 16 : index
    %62 = vector.load %arg11[%c0_25, %c16] : memref<8x32xf32, #tpu.memory_space<vmem>>, vector<8x8xf32>
    tpu.vector_store %arg11[%c0_25, %c16], %61 {strides = array<i32>} : memref<8x32xf32, #tpu.memory_space<vmem>>, vector<8x8xf32>,
    %63 = vector.extract_strided_slice %9 {offsets = [0, 24], sizes = [8, 8], strides = [1, 1]} : vector<8x32xbf16> to vector<8x8xbf16>
    %64 = vector.extract_strided_slice %10 {offsets = [0, 24], sizes = [8, 8], strides = [1, 1]} : vector<8x32xbf16> to vector<8x8xbf16>
    %65 = vector.extract_strided_slice %11 {offsets = [0, 24], sizes = [8, 8], strides = [1, 1]} : vector<8x32xbf16> to vector<8x8xbf16>
    %cst_26 = arith.constant dense<0.000000e+00> : vector<8x8xf32>
    %66 = tpu.matmul %63, %64, %cst_26 {dimension_numbers = #tpu.dot_dimension_numbers<[1], [1], [0], [0], [0, 0, 1, 0], [], []>} : vector<8x8xbf16>, vector<8x8xbf16>, vector<8x8xf32> -> vector<8x8xf32>
    %cst_27 = arith.constant dense<0xFF800000> : vector<8xf32>
    %67 = vector.multi_reduction <maximumf>, %66, %cst_27 [1] : vector<8x8xf32> to vector<8xf32>
    %68 = vector.shape_cast %67 : vector<8xf32> to vector<8x1xf32>
    %69 = vector.broadcast %68 : vector<8x1xf32> to vector<8x8xf32>
    %70 = arith.subf %66, %69 : vector<8x8xf32>
    %71 = math.exp %70 : vector<8x8xf32>
    %cst_28 = arith.constant dense<0.000000e+00> : vector<8xf32>
    %72 = vector.multi_reduction <add>, %71, %cst_28 [1] : vector<8x8xf32> to vector<8xf32>
    %73 = vector.shape_cast %72 : vector<8xf32> to vector<8x1xf32>
    %74 = arith.truncf %71 : vector<8x8xf32> to vector<8x8xbf16>
    %cst_29 = arith.constant dense<0.000000e+00> : vector<8x8xf32>
    %75 = tpu.matmul %74, %65, %cst_29 {dimension_numbers = #tpu.dot_dimension_numbers<[1], [0], [0], [1], [0, 0, 1, 1], [], []>} : vector<8x8xbf16>, vector<8x8xbf16>, vector<8x8xf32> -> vector<8x8xf32>
    %76 = tpu.reciprocal %73 {approx = true} : vector<8x1xf32> -> vector<8x1xf32>
    %77 = vector.broadcast %76 : vector<8x1xf32> to vector<8x8xf32>
    %78 = arith.mulf %75, %77 : vector<8x8xf32>
    %c0_30 = arith.constant 0 : index
    %c24 = arith.constant 24 : index
    %79 = vector.load %arg11[%c0_30, %c24] : memref<8x32xf32, #tpu.memory_space<vmem>>, vector<8x8xf32>
    tpu.vector_store %arg11[%c0_30, %c24], %78 {strides = array<i32>} : memref<8x32xf32, #tpu.memory_space<vmem>>, vector<8x8xf32>,
    %c0_31 = arith.constant 0 : index
    %c0_32 = arith.constant 0 : index
    %80 = vector.load %arg11[%c0_31, %c0_32] : memref<8x32xf32, #tpu.memory_space<vmem>>, vector<8x32xf32>
    %81 = arith.truncf %80 : vector<8x32xf32> to vector<8x32xbf16>
    %c0_33 = arith.constant 0 : index
    %c0_34 = arith.constant 0 : index
    %82 = vector.load %arg7[%c0_33, %c0_34] : memref<32x32xbf16, #tpu.memory_space<vmem>>, vector<32x32xbf16>
    %cst_35 = arith.constant dense<0.000000e+00> : vector<8x32xf32>
    %83 = tpu.matmul %81, %82, %cst_35 {dimension_numbers = #tpu.dot_dimension_numbers<[1], [1], [0], [0], [0, 0, 1, 0], [], []>} : vector<8x32xbf16>, vector<32x32xbf16>, vector<8x32xf32> -> vector<8x32xf32>
    %c0_36 = arith.constant 0 : index
    %c0_37 = arith.constant 0 : index
    %c0_38 = arith.constant 0 : index
    %84 = vector.load %arg8[%c0_36, %c0_37, %c0_38] : memref<1x8x32xf32, #tpu.memory_space<vmem>>, vector<1x8x32xf32>
    %85 = vector.shape_cast %84 : vector<1x8x32xf32> to vector<8x32xf32>
    %86 = vector.shape_cast %83 : vector<8x32xf32> to vector<1x8x32xf32>
    tpu.vector_store %arg8[%c0_36, %c0_37, %c0_38], %86 {strides = array<i32>} : memref<1x8x32xf32, #tpu.memory_space<vmem>>, vector<1x8x32xf32>,
    return
  }
  func.func @transform_0(%arg0: i32, %arg1: i32) -> (i32, i32, i32) {
    %c0_i32 = arith.constant 0 : i32
    %c0_i32_0 = arith.constant 0 : i32
    return %arg0, %arg1, %c0_i32 : i32, i32, i32
  }
  func.func @transform_1(%arg0: i32, %arg1: i32) -> (i32, i32, i32) {
    %c0_i32 = arith.constant 0 : i32
    %c0_i32_0 = arith.constant 0 : i32
    %c0_i32_1 = arith.constant 0 : i32
    return %arg0, %c0_i32, %c0_i32_0 : i32, i32, i32
  }
  func.func @transform_2(%arg0: i32, %arg1: i32) -> (i32, i32) {
    %c0_i32 = arith.constant 0 : i32
    %c0_i32_0 = arith.constant 0 : i32
    %c0_i32_1 = arith.constant 0 : i32
    return %c0_i32, %c0_i32_0 : i32, i32
  }
  func.func @transform_3(%arg0: i32, %arg1: i32) -> (i32, i32) {
    %c0_i32 = arith.constant 0 : i32
    %c0_i32_0 = arith.constant 0 : i32
    %c0_i32_1 = arith.constant 0 : i32
    return %c0_i32, %c0_i32_0 : i32, i32
  }
  func.func @transform_4(%arg0: i32, %arg1: i32) -> (i32, i32) {
    %c0_i32 = arith.constant 0 : i32
    %c0_i32_0 = arith.constant 0 : i32
    %c0_i32_1 = arith.constant 0 : i32
    return %c0_i32, %c0_i32_0 : i32, i32
  }
  func.func @transform_5(%arg0: i32, %arg1: i32) -> (i32, i32) {
    %c0_i32 = arith.constant 0 : i32
    %c0_i32_0 = arith.constant 0 : i32
    %c0_i32_1 = arith.constant 0 : i32
    return %c0_i32, %c0_i32_0 : i32, i32
  }
  func.func @transform_6(%arg0: i32, %arg1: i32) -> (i32, i32, i32) {
    %c0_i32 = arith.constant 0 : i32
    %c0_i32_0 = arith.constant 0 : i32
    return %arg0, %arg1, %c0_i32 : i32, i32, i32
  }
}

</mosaic_0001>

<bundles_post_ra>
// kernel: tpu_custom_call.1
= control target key start
LH: loop header
LB: loop body
LE: loop exit
PB: predicated region body
PF: predicated region fallthrough
CT: control target
= control target key end

     0   :  { %s2234_s0 = inlined_call_operand.hbm [shape: bf16[2,8,32], index: 0, kind: input, shape index: {}]   ;;  %s2235_s1 = inlined_call_operand.hbm [shape: bf16[2,8,32], index: 1, kind: input, shape index: {}]   ;;  %s2236_s2 = inlined_call_operand.hbm [shape: bf16[32,32], index: 2, kind: input, shape index: {}]   ;;  %s2237_s3 = inlined_call_operand.hbm [shape: bf16[32,32], index: 3, kind: input, shape index: {}]   ;;  %s2238_s4 = inlined_call_operand.hbm [shape: bf16[32,32], index: 4, kind: input, shape index: {}]   ;;  %s2239_s5 = inlined_call_operand.vmem [shape: bf16[32,32], index: 5, kind: input, shape index: {}]   ;;  %s2240_s6 = inlined_call_operand.hbm [shape: f32[2,8,32], index: 6, kind: output, shape index: {}]  }
   0x1   :  { %2247 = sst [smem:[#allocation22_spill]] %s2236_s2 }
   0x2   :  { %2248 = sst [smem:[#allocation23_spill]] %s2237_s3 }
   0x3   :  { %2249 = sst [smem:[#allocation24_spill]] %s2238_s4 }
   0x4   :  { %11 = vsyncpa [#allocation6], 0 }
   0x5   :  { %13 = vsyncpa [#allocation6 + $0x1], 0 }
   0x6   :  { %14 = vsyncpa [#allocation9], 0 }
   0x7   :  { %16 = vsyncpa [#allocation9 + $0x1], 0 }
   0x8   :  { %17 = vsyncpa [#allocation12], 0 }
   0x9   :  { %18 = vsyncpa [#allocation7], 0 }
   0xa   :  { %20 = vsyncpa [#allocation7 + $0x1], 0  ;;  %s1819_s21 = smov 0   ;;  %s1821_s22 = smov 0  }
   0xb   :  { %s1823_s23 = smov 0   ;;  %s1825_s24 = smov 0  }
   0xc   :  { %s1827_s25 = smov 0   ;;  %s1829_s26 = smov 0  }
   0xd LB: > { %2250 = sst [smem:[#allocation20_spill]] %s1746_s21  ;;  %s1850_s27 = sadd.s32 4294967295, %s1766_s26   ;;  %s1766_s26 = sphi %s1829_s26, %s26_s26   ;;  %s1762_s25 = sphi %s1827_s25, %s2278_s25   ;;  %s1758_s24 = sphi %s1825_s24, %s2277_s24   ;;  %s1754_s23 = sphi %s1823_s23, %s2276_s23   ;;  %s1750_s22 = sphi %s1821_s22, %s2275_s22   ;;  %s1746_s21 = sphi %s1819_s21, %s2274_s21  }
   0xe   : > { %s1243_s28 = sadd.s32 4294967294, %s1766_s26   ;;  %p60_p0 = scmp.ne.s32.totalorder %s1750_s22, %s1746_s21 }
   0xf   : > { %p2241_p1 = scmp.eq.s32.totalorder %s1850_s27, 0  ;;  %p202_p3 = scmp.eq.s32.totalorder %s1243_s28, 1 }
  0x10   : > { %p1244_p5 = scmp.ge.s32.totalorder %s1766_s26, 1  ;;  %p209_p7 = scmp.lt.s32.totalorder %s1766_s26, 3 }
  0x11   : > { %p1859_p4 = por %p2241_p1, %p60_p0  ;;  %p1864_p6 = por %p202_p3, %p60_p0 }
  0x12   : > { %p1869_p8 = pnand %p1244_p5, %p209_p7  ;;  %s1768_s8 = smov [#allocation10]  }
  0x13   : > { %s2251_s29 = scalar_select %p1859_p4, 1, 0 }
  0x14   : > { %s2252_s30 = scalar_select %p1864_p6, 1, 0 }
  0x15   : > { %s2254_s7 = scalar_select %p1869_p8, 1, 0 }
  0x16   : > { %2253 = sst [smem:[#allocation21_spill]] %s2252_s30  ;;  %s221_s9 = sshll.u32 %s1768_s8, 4  ;;  %s1873_s9 = int_to_ptr.vmem [resolvable:$true] %s221_s9 }
  0x17   : > { %p1412_p9 = pneg %p1869_p8  ;;  %s1769_s11 = smov [#allocation11]  }
  0x18   : > { %s234_s12 = sshll.u32 %s1769_s11, 4  ;;  %s1770_s13 = smov [#allocation13]   ;;  %s1884_s12 = int_to_ptr.vmem [resolvable:$true] %s234_s12 }
  0x19   : > { %p1880_p11 = pnand %p1412_p9, %p2241_p1  ;;  %s1886_s14 = sshll.u32 %s1770_s13, 4  ;;  %s248_s14 = int_to_ptr.vmem [resolvable:$true] %s1886_s14 }
  0x1a   : > { %s2256_s2 = sld [smem:[#allocation22_spill]] }
  0x1b   : > { %p1896_p13 = pneg %p1880_p11 }
  0x20   : > { %s1528_s17 = scalar_lea.hbm %s2256_s2, 256 }
  0x21   : > { %p1529_p12 = scmp.ne.s32.totalorder %s2256_s2, %s1528_s17  ;;  %p1535_p5 = scmp.lt.u32.totalorder %s1528_s17, %s2256_s2 }
  0x23   : > { %p1531_p0 = pnand %p1896_p13, %p1529_p12 }
  0x25   : > { %p1532_p3 = pneg %p1531_p0 }
  0x27   : > { %p1537_p7 = pnand %p1535_p5, %p1532_p3 }
  0x29   : > { %1540 = shalt.err (!%p1537_p7)
}
  0x2a   : > { %s1541_s11 = scalar_lea.vmem %s1873_s9, 256  ;;  %p1549_p2 = scmp.lt.s32.totalorder %s1873_s9, %s1873_s9 }
  0x2b   : > { %p1542_p9 = scmp.ne.s32.totalorder %s1873_s9, %s1541_s11  ;;  %p1550_p6 = scmp.lt.s32.totalorder %s1541_s11, %s1541_s11 }
  0x2d   : > { %p1544_p10 = pnand %p1542_p9, %p1896_p13  ;;  %p1551_p12 = por %p1550_p6, %p1549_p2 }
  0x2f   : > { %p1545_p1 = pneg %p1544_p10 }
  0x31   : > { %p1552_p0 = pnand %p1551_p12, %p1545_p1 }
  0x33   : > { %1555 = shalt.err (!%p1552_p0)
}
  0x34   : > { %s1771_s13 = smov 64   ;;  %s1772_s15 = smov 4  }
  0x35   : > { %1415 = dma.hbm_to_vmem [thread:$0]  (!%p1880_p11), %s2256_s2, 256, %s1873_s9, [#allocation9], %s1771_s13, %s1771_s13, %s1772_s15  }
  0x36   : > { %s2258_s3 = sld [smem:[#allocation23_spill]] }
  0x3c   : > { %s1556_s28 = scalar_lea.hbm %s2258_s3, 256 }
  0x3d   : > { %p1557_p1 = scmp.ne.s32.totalorder %s2258_s3, %s1556_s28  ;;  %p1563_p10 = scmp.lt.u32.totalorder %s1556_s28, %s2258_s3 }
  0x3f   : > { %p1559_p2 = pnand %p1557_p1, %p1896_p13 }
  0x41   : > { %p1560_p6 = pneg %p1559_p2 }
  0x43   : > { %p1565_p3 = pnand %p1563_p10, %p1560_p6 }
  0x45   : > { %1568 = shalt.err (!%p1565_p3)
}
  0x46   : > { %s1569_s9 = scalar_lea.vmem %s1884_s12, 256  ;;  %p1577_p12 = scmp.lt.s32.totalorder %s1884_s12, %s1884_s12 }
  0x47   : > { %p1570_p5 = scmp.ne.s32.totalorder %s1884_s12, %s1569_s9  ;;  %p1578_p0 = scmp.lt.s32.totalorder %s1569_s9, %s1569_s9 }
  0x49   : > { %p1572_p7 = pnand %p1570_p5, %p1896_p13  ;;  %p1579_p1 = por %p1578_p0, %p1577_p12 }
  0x4b   : > { %p1573_p9 = pneg %p1572_p7 }
  0x4d   : > { %p1580_p2 = pnand %p1579_p1, %p1573_p9 }
  0x4f   : > { %1583 = shalt.err (!%p1580_p2)
}
  0x50   : > { %1418 = dma.hbm_to_vmem [thread:$0]  (!%p1880_p11), %s2258_s3, 256, %s1884_s12, [#allocation12], %s1771_s13, %s1771_s13, %s1772_s15  }
  0x51   : > { %s2259_s4 = sld [smem:[#allocation24_spill]] }
  0x57   : > { %s1584_s18 = scalar_lea.hbm %s2259_s4, 256 }
  0x58   : > { %p1585_p6 = scmp.ne.s32.totalorder %s2259_s4, %s1584_s18  ;;  %p1591_p5 = scmp.lt.u32.totalorder %s1584_s18, %s2259_s4 }
  0x5a   : > { %p1587_p10 = pnand %p1585_p6, %p1896_p13 }
  0x5c   : > { %p1588_p3 = pneg %p1587_p10 }
  0x5e   : > { %p1593_p7 = pnand %p1591_p5, %p1588_p3 }
  0x60   : > { %1596 = shalt.err (!%p1593_p7)
}
  0x61   : > { %s1597_s9 = scalar_lea.vmem %s248_s14, 256  ;;  %p1605_p1 = scmp.lt.s32.totalorder %s248_s14, %s248_s14 }
  0x62   : > { %p1598_p9 = scmp.ne.s32.totalorder %s248_s14, %s1597_s9  ;;  %p1606_p2 = scmp.lt.s32.totalorder %s1597_s9, %s1597_s9 }
  0x64   : > { %p1600_p12 = pnand %p1598_p9, %p1896_p13  ;;  %p1607_p4 = por %p1606_p2, %p1605_p1 }
  0x66   : > { %p1601_p0 = pneg %p1600_p12 }
  0x68   : > { %p1608_p8 = pnand %p1607_p4, %p1601_p0 }
  0x6a   : > { %1611 = shalt.err (!%p1608_p8)
}
  0x6b   : > { %1421 = dma.hbm_to_vmem [thread:$0]  (!%p1880_p11), %s2259_s4, 256, %s248_s14, [#allocation12], %s1771_s13, %s1771_s13, %s1772_s15  }
  0x6c   : > { %s47_s20 = sadd.s32 1, %s1754_s23  ;;  %s38_s10 = sadd.s32 1, %s1762_s25 }
  0x6d   : > { %p54_p4 = scmp.ne.s32.totalorder %s1754_s23, %s1750_s22  ;;  %p40_p8 = scmp.ge.s32.totalorder %s38_s10, 2 }
  0x6e   : > { %p55_p13 = scmp.eq.s32.totalorder %s1766_s26, 0  ;;  %p2260_p6 = scmp.eq.s32.totalorder %s1850_s27, 1 }
  0x6f   : > { %p1436_p3 = scmp.lt.s32.totalorder %s1766_s26, 2  ;;  %s2280_s10 = smov (%p40_p8, %s38_s10), 0 }
  0x70   : > { %p1975_p10 = por %p2260_p6, %p54_p4  ;;  %p56_p5 = por %p55_p13, %p54_p4 }
  0x71   : > { %s264_s16 = sand.u32 1, %s1754_s23   ;;  %s42_s17 = ssub.s32 %s1762_s25, %s2280_s10 }
  0x72   : > { %s2261_s30 = scalar_select %p1975_p10, 1, 0 }
  0x73   : > { %p45_p11 = scmp.eq.s32.totalorder %s42_s17, 0  ;;  %s1985_s14 = sshll.u32 %s264_s16, 2 }
  0x74   : > { %s1250_s13 = sshll.u32 %s1762_s25, 6  ;;  %s268_s8 = scalar_lea.vmem [#allocation5], %s1985_s14 }
  0x75   : > { %s1989_s15 = scalar_select %p45_p11, %s1754_s23, %s47_s20  }
  0x76   : > { %s1994_s28 = scalar_lea.hbm %s2234_s0, %s1250_s13  ;;  %s276_s11 = sshll.u32 %s268_s8, 4  ;;  %s1997_s11 = int_to_ptr.vmem [resolvable:$true] %s276_s11 }
  0x77   : > { %p2001_p7 = pnand %p1436_p3, %p56_p5  ;;  %s2008_s20 = scalar_lea.hbm %s2235_s1, %s1250_s13 }
  0x78   : > { %s283_s17 = sand.u32 1, %s1766_s26   ;;  %s265_s18 = scalar_lea.sflag [#allocation6], %s264_s16 }
  0x79   : > { %s1612_s19 = scalar_lea.hbm %s1994_s28, 64  ;;  %p1614_p12 = pneg %p2001_p7 }
  0x7a   : > { %p1613_p9 = scmp.ne.s32.totalorder %s1994_s28, %s1612_s19  ;;  %s1617_s3 = scalar_lea.hbm %s2234_s0, 128 }
  0x7b   : > { %p1618_p2 = scmp.lt.u32.totalorder %s1994_s28, %s2234_s0  ;;  %p1619_p4 = scmp.lt.u32.totalorder %s1617_s3, %s1612_s19 }
  0x7c   : > { %p1615_p0 = pnand %p1614_p12, %p1613_p9  ;;  %p1621_p13 = scmp.lt.u32.totalorder %s1612_s19, %s1994_s28 }
  0x7d   : > { %p1620_p8 = por %p1619_p4, %p1618_p2 }
  0x7e   : > { %p1616_p1 = pneg %p1615_p0 }
  0x7f   : > { %p1622_p6 = por %p1621_p13, %p1620_p8 }
  0x81   : > { %p1623_p3 = pnand %p1622_p6, %p1616_p1 }
  0x83   : > { %1626 = shalt.err (!%p1623_p3)
}
  0x84   : > { %s1627_s16 = scalar_lea.vmem %s1997_s11, 64  ;;  %s1773_s2 = smov [#allocation5]  }
  0x85   : > { %p1628_p5 = scmp.ne.s32.totalorder %s1997_s11, %s1627_s16  ;;  %s1632_s13 = sshll.u32 %s1773_s2, 4  ;;  %s1633_s13 = int_to_ptr.vmem [resolvable:$false] %s1632_s13 }
  0x86   : > { %s1634_s4 = scalar_lea.vmem %s1633_s13, 128  ;;  %p1635_p0 = scmp.lt.s32.totalorder %s1997_s11, %s1633_s13 }
  0x87   : > { %p1630_p11 = pnand %p1628_p5, %p1614_p12  ;;  %p1636_p2 = scmp.lt.s32.totalorder %s1634_s4, %s1627_s16 }
  0x89   : > { %p1631_p9 = pneg %p1630_p11  ;;  %p1637_p4 = por %p1636_p2, %p1635_p0 }
  0x8b   : > { %p1638_p8 = pnand %p1637_p4, %p1631_p9 }
  0x8d   : > { %1641 = shalt.err (!%p1638_p8)
}
  0x8e   : > { %1425 = dma.hbm_to_vmem [thread:$0]  (!%p2001_p7), %s1994_s28, 64, %s1997_s11, %s265_s18  }
  0x8f   : > { %s287_s3 = scalar_lea.vmem [#allocation8], %s1985_s14  ;;  %s284_s19 = scalar_lea.sflag [#allocation9], %s283_s17 }
  0x90   : > { %s294_s21 = sshll.u32 %s287_s3, 4  ;;  %s1642_s8 = scalar_lea.hbm %s2008_s20, 64  ;;  %s295_s21 = int_to_ptr.vmem [resolvable:$true] %s294_s21 }
  0x91   : > { %p1643_p1 = scmp.ne.s32.totalorder %s2008_s20, %s1642_s8  ;;  %s1647_s2 = scalar_lea.hbm %s2235_s1, 128 }
  0x92   : > { %p1648_p3 = scmp.lt.u32.totalorder %s2008_s20, %s2235_s1  ;;  %p1649_p5 = scmp.lt.u32.totalorder %s1647_s2, %s1642_s8 }
  0x93   : > { %p1645_p13 = pnand %p1643_p1, %p1614_p12  ;;  %p1651_p9 = scmp.lt.u32.totalorder %s1642_s8, %s2008_s20 }
  0x94   : > { %p1650_p11 = por %p1649_p5, %p1648_p3 }
  0x95   : > { %p1646_p6 = pneg %p1645_p13 }
  0x96   : > { %p1652_p0 = por %p1651_p9, %p1650_p11 }
  0x98   : > { %p1653_p2 = pnand %p1652_p0, %p1646_p6 }
  0x9a   : > { %1656 = shalt.err (!%p1653_p2)
}
  0x9b   : > { %s1657_s14 = scalar_lea.vmem %s295_s21, 64  ;;  %s1774_s28 = smov [#allocation8]  }
  0x9c   : > { %p1658_p4 = scmp.ne.s32.totalorder %s295_s21, %s1657_s14  ;;  %s1662_s11 = sshll.u32 %s1774_s28, 4  ;;  %s1663_s11 = int_to_ptr.vmem [resolvable:$false] %s1662_s11 }
  0x9d   : > { %s1664_s17 = scalar_lea.vmem %s1663_s11, 128  ;;  %p1665_p13 = scmp.lt.s32.totalorder %s295_s21, %s1663_s11 }
  0x9e   : > { %p1660_p8 = pnand %p1658_p4, %p1614_p12  ;;  %p1666_p10 = scmp.lt.s32.totalorder %s1664_s17, %s1657_s14 }
  0xa0   : > { %p1661_p1 = pneg %p1660_p8  ;;  %p1667_p3 = por %p1666_p10, %p1665_p13 }
  0xa2   : > { %p1668_p5 = pnand %p1667_p3, %p1661_p1 }
  0xa4   : > { %1671 = shalt.err (!%p1668_p5)
}
  0xa5   : > { %1428 = dma.hbm_to_vmem [thread:$0]  (!%p2001_p7), %s2008_s20, 64, %s295_s21, %s284_s19  }
  0xa6   : > { %p2263_p6 = scmp.ne.s32.totalorder %s2254_s7, 0 }
  0xa7   : > { %s2061_s18 = sand.u32 (!%p2263_p6), 1, %s1750_s22   ;;  %p2264_p10 = scmp.ne.s32.totalorder (!%p2263_p6), %s2251_s29, 0 }
  0xa8   : > { %303 = sbr.rel (%p2263_p6) target bundleno = 1769 (0x6e9), region = 44  ;;  %s1254_s3 = sshll.u32 (!%p2263_p6), %s2061_s18, 2 }
  0xa9   : > { %s306_s8 = scalar_lea.sflag (!%p2263_p6), [#allocation6], %s2061_s18  ;;  %s2065_s12 = scalar_lea.vmem (!%p2263_p6), [#allocation5], %s1254_s3 }
  0xaf   : > { %1725 = dma.done.wait (%p2264_p10), %s306_s8, 64  }
  0xb0   : > { %1727 = vsyncadd (%p2264_p10), %s306_s8, 4294967232  ;;  %s314_s9 = sand.u32 1, %s1850_s27   ;;  %s318_s20 = scalar_lea.vmem [#allocation8], %s1254_s3 }
  0xb1   : > { %s315_s7 = scalar_lea.sflag [#allocation9], %s314_s9 }
  0xb2   : > { %1729 = dma.done.wait (%p2264_p10), %s315_s7, 64  }
  0xb3   : > { %1731 = vsyncadd (%p2264_p10), %s315_s7, 4294967232  ;;  %p2265_p7 = scmp.eq.s32.totalorder %s1850_s27, 0 }
  0xb5   : > { %1733 = dma.done.wait (%p2265_p7), [#allocation9], 256   ;;  %p2266_p12 = pmov %p2265_p7 }
  0xb6   : > { %p2267_p11 = pmov %p2265_p7 }
  0xb7   : > { %1735 = vsyncadd (%p2266_p12), [#allocation9], 4294967040 }
  0xb8   : > { %1737 = dma.done.wait (%p2267_p11), [#allocation12], 512   ;;  %p2268_p9 = pmov %p2265_p7 }
  0xb9   : > { %v1775_v0 = vmov 0.0   ;;  %vm1776_vm0 = vmmov 0   ;;  %vm384_vm1 = vcmask 261120   ;;  %v1502_v1 = vld [vmem:[#allocation11] sm:$0xff]   ;;  %v1503_v3 = vld [vmem:[#allocation11 + $0x8] sm:$0xff]   ;;  %v1506_v4 = vld [vmem:[#allocation13] sm:$0xff]  }
  0xba   : > { %1739 = vsyncadd (%p2268_p9), [#allocation12], 4294966784  ;;  %1314 = vmatprep.subr.bf16.mxu0 %v1775_v0  ;;  %1318 = vmatprep.mubr.msk.bf16.mxu0 %vm1776_vm0, %v1775_v0  ;;  %v389_v2 = vsel %vm384_vm1, %v1502_v1, 0  ;;  %v449_v5 = vsel %vm384_vm1, %v1506_v4, 0  ;;  %v392_v6 = vsel %vm384_vm1, %v1503_v3, 0  ;;  %v1504_v7 = vld [vmem:[#allocation10] sm:$0xff]  }
  0xbb   : > { %1322 = vmatprep.subr.bf16.mxu1 %v1775_v0  ;;  %1326 = vmatprep.mubr.msk.bf16.mxu1 %vm1776_vm0, %v1775_v0  ;;  %v369_v8 = vld [vmem:[%s318_s20] sm:$0xf]  ;;  %v519_v9 = vsel %vm384_vm1, %v1504_v7, 0  ;;  %v1505_v10 = vld [vmem:[#allocation10 + $0x8] sm:$0xff]   ;;  %v499_v12 = vld [vmem:[%s2065_s12] sm:$0xf] }
  0xbc   : > { %1315 = vmatpush3.bf16.xpose.msra.mxu0 %v389_v2  ;;  %1323 = vmatpush3.bf16.xpose.msra.mxu1 %v449_v5  ;;  %v522_v11 = vsel %vm384_vm1, %v1505_v10, 0  ;;  %v1507_v13 = vld [vmem:[#allocation13 + $0x8] sm:$0xff]   ;;  %vm495_vm2 = vcmask 257024   ;;  %vm568_vm3 = vcmask 64512   ;;  %s1777_s27 = smov 120   ;;  %s1778_s29 = smov 112  }
  0xbd   : > { %1316 = vmatprep.subr.bf16.mxu0 %v1775_v0  ;;  %1324 = vmatprep.subr.bf16.mxu1 %v1775_v0  ;;  %v452_v14 = vsel %vm384_vm1, %v1507_v13, 0  ;;  %s1779_s21 = smov 104   ;;  %vm628_vm4 = vcmask 1043456   ;;  %s1780_s2 = smov 8   ;;  %vm796_vm5 = vcmask 130112   ;;  %vm912_vm6 = vcmask 195712  }
  0xbe   : > { %s1781_s14 = smov 16   ;;  %s1782_s28 = smov 24   ;;  %vm1028_vm7 = vcmask 261312  }
  0xbf   : > { %s1259_s11 = sshll.u32 %s2061_s18, 3  ;;  %s1283_s17 = sshll.u32 %s1758_s24, 7 }
  0xc0   : > { %s363_s3 = scalar_lea.vmem [#allocation14], %s1259_s11  ;;  %s2184_s7 = scalar_lea.hbm %s2240_s6, %s1283_s17 }
  0xc1   : > { %s1111_s8 = sshll.u32 %s363_s3, 4  ;;  %s1097_s20 = scalar_lea.sflag [#allocation7], %s2061_s18  ;;  %s2186_s8 = int_to_ptr.vmem [resolvable:$true] %s1111_s8 }
  0xc2   : > { %p2269_p2 = scmp.ne.s32.totalorder %s2261_s30, 0  ;;  %s1783_s24 = smov [#allocation14]  }
  0xc4   : > { %1317 = vmatpush3.bf16.xpose.msra.mxu0 %v392_v6  ;;  %1325 = vmatpush3.bf16.xpose.msra.mxu1 %v452_v14 }
  0xc5   : > { %1330 = vmatprep.subr.bf16.mxu0 %v1775_v0  ;;  %1338 = vmatprep.subr.bf16.mxu1 %v1775_v0 }
  0xcb   : > { %1319 = vmatmul.mubr.msk.bf16.vlgmr.msra.gmra.mrb[0].mxu0 %vm384_vm1, %v369_v8  ;;  %1327 = vmatmul.mubr.msk.bf16.vlgmr.msra.gmra.mrb[0].mxu1 %vm384_vm1, %v369_v8 }
  0xcc   : > { %1331 = vmatpush3.bf16.xpose.msra.mxu0 %v519_v9  ;;  %1334 = vmatprep.mubr.msk.bf16.mxu0 %vm1776_vm0, %v1775_v0 }
  0xcd   : > { %1332 = vmatprep.subr.bf16.mxu0 %v1775_v0  ;;  %1340 = vmatprep.mubr.msk.bf16.mxu1 %vm1776_vm0, %v1775_v0 }
  0xd4   : > { %1333 = vmatpush3.bf16.xpose.msra.mxu0 %v522_v11 }
  0xd5   : > { %1362 = vmatprep.subr.bf16.mxu0 %v1775_v0 }
  0xdb   : > { %1335 = vmatmul.mubr.msk.bf16.vlgmr.msra.gmra.mrb[4].mxu0 %vm384_vm1, %v499_v12 }
  0xdc   : > { %1364 = vmatprep.mubr.msk.bf16.mxu0 %vm1776_vm0, %v1775_v0 }
 0x19e   : > { %v428_v15 = vpop.f32.mrb[0].mxu0  ;;  %v488_v29 = vpop.f32.mrb[0].mxu1 }
 0x19f   : > { %v494_v16 = vpack.c.bf16 %v428_v15, %v428_v15  ;;  %v1320_v17 = vpop.f32.mrb[1].mxu0  ;;  %v497_v30 = vpack.c.bf16 %v488_v29, %v488_v29  ;;  %v1328_v31 = vpop.f32.mrb[1].mxu1 }
 0x1a0   : > { %v431_v18 = vpop.f32.mrb[2].mxu0  ;;  %v491_v32 = vpop.f32.mrb[2].mxu1 }
 0x1a1   : > { %496 = vst.msk [vmem:[#allocation2] sm:$0xf] %vm495_vm2, %v494_v16  ;;  %v1321_v19 = vpop.f32.mrb[3].mxu0  ;;  %498 = vst.msk [vmem:[#allocation3] sm:$0xf] %vm495_vm2, %v497_v30  ;;  %v1329_v33 = vpop.f32.mrb[3].mxu1 }
 0x1a8   : > { %v566_v20 = vld [vmem:[#allocation2] sm:$0xf]  ;;  %v567_v34 = vld [vmem:[#allocation3] sm:$0xf] }
 0x1a9   : > { %v573_v21 = vsel %vm568_vm3, %v566_v20, 0  ;;  %v1271_v28 = vcombine.low %v566_v20, %v566_v20  ;;  %v630_v35 = vsel %vm628_vm4, %v567_v34, 0  ;;  %v1273_v61 = vcombine.low %v567_v34, %v567_v34 }
 0x1aa   : > { %1339 = vmatpush3.bf16.xpose.msra.mxu1 %v573_v21 }
 0x1ab   : > { %1344 = vmatprep.subr.bf16.mxu1 %v1775_v0 }
 0x1ae   : > { %v558_v22 = vpop.f32.mrb[4].mxu0 }
 0x1af   : > { %v564_v23 = vmul.f32 0.35355338, %v558_v22  ;;  %v1336_v24 = vpop.f32.mrb[5].mxu0 }
 0x1b0   : > { %v561_v25 = vpop.f32.mrb[6].mxu0 }
 0x1b1   : > { %v565_v26 = vpack.c.bf16 %v564_v23, %v564_v23  ;;  %v1337_v27 = vpop.f32.mrb[7].mxu0 }
 0x1b3   : > { %676 = vrot.lane.b32.xlu1 %v565_v26, %s1777_s27  ;;  %1341 = vmatmul.mubr.msk.bf16.vlgmr.msra.gmra.mrb[4].mxu1 %vm568_vm3, %v565_v26 }
 0x1b4   : > { %1346 = vmatprep.mubr.msk.bf16.mxu1 %vm1776_vm0, %v1775_v0  ;;  %1345 = vmatpush3.bf16.msra.mxu1 %v630_v35 }
 0x1b5   : > { %1350 = vmatprep.subr.bf16.mxu1 %v1775_v0 }
 0x1b7   : > { %800 = vrot.lane.b32.xlu1 %v1271_v28, %s1778_s29 }
 0x1bb   : > { %798 = vrot.lane.b32.xlu1 %v565_v26, %s1778_s29 }
 0x1bf   : > { %916 = vrot.lane.b32.xlu1 %v1271_v28, %s1779_s21 }
 0x1c3   : > { %914 = vrot.lane.b32.xlu1 %v565_v26, %s1779_s21 }
 0x225   : > { %v677_v36 = vpop.permute.xlu1 %676 }
 0x229   : > { %v801_v37 = vpop.permute.xlu1 %800 }
 0x22a   : > { %v806_v38 = vsel %vm568_vm3, %v801_v37, 0 }
 0x22b   : > { %1363 = vmatpush3.bf16.xpose.msra.mxu0 %v806_v38 }
 0x22c   : > { %1374 = vmatprep.subr.bf16.mxu0 %v1775_v0 }
 0x22d   : > { %v799_v39 = vpop.permute.xlu1 %798 }
 0x231   : > { %v917_v40 = vpop.permute.xlu1 %916 }
 0x232   : > { %v922_v41 = vsel %vm568_vm3, %v917_v40, 0  ;;  %1365 = vmatmul.mubr.msk.bf16.vlgmr.msra.gmra.mrb[8].mxu0 %vm568_vm3, %v799_v39 }
 0x233   : > { %1375 = vmatpush3.bf16.xpose.msra.mxu0 %v922_v41  ;;  %1376 = vmatprep.mubr.msk.bf16.mxu0 %vm1776_vm0, %v1775_v0 }
 0x234   : > { %1386 = vmatprep.subr.bf16.mxu0 %v1775_v0 }
 0x235   : > { %v915_v42 = vpop.permute.xlu1 %914 }
 0x23a   : > { %1377 = vmatmul.mubr.msk.bf16.vlgmr.msra.gmra.mrb[12].mxu0 %vm568_vm3, %v915_v42 }
 0x23b   : > { %1390 = vmatprep.mubr.msk.bf16.mxu0 %vm1776_vm0, %v1775_v0 }
 0x286   : > { %v609_v43 = vpop.f32.mrb[4].mxu1 }
 0x287   : > { %v1342_v44 = vpop.f32.mrb[5].mxu1  ;;  %v615_v45 = vsel %vm568_vm3, %v609_v43, -inf }
 0x288   : > { %616 = vmax.xlane.f32.xlu0 %v615_v45  ;;  %v612_v46 = vpop.f32.mrb[6].mxu1 }
 0x289   : > { %v1343_v47 = vpop.f32.mrb[7].mxu1 }
 0x29e   : > { %681 = vrot.lane.b32.xlu0 %v1271_v28, %s1777_s27 }
 0x305   : > { %v842_v48 = vpop.f32.mrb[8].mxu0 }
 0x306   : > { %v1366_v49 = vpop.f32.mrb[9].mxu0  ;;  %v848_v50 = vsel %vm568_vm3, %v842_v48, -inf }
 0x307   : > { %849 = vmax.xlane.f32.xlu0 %v848_v50  ;;  %v845_v51 = vpop.f32.mrb[10].mxu0 }
 0x308   : > { %v1367_v52 = vpop.f32.mrb[11].mxu0  ;;  %v1511_v51 = vld [vmem:[%s2239_s5 + $0x8] sm:$0xff]  }
 0x30d   : > { %v958_v53 = vpop.f32.mrb[12].mxu0 }
 0x30e   : > { %v1378_v54 = vpop.f32.mrb[13].mxu0  ;;  %v964_v55 = vsel %vm568_vm3, %v958_v53, -inf }
 0x30f   : > { %965 = vmax.xlane.f32.xlu1 %v964_v55  ;;  %v961_v56 = vpop.f32.mrb[14].mxu0  ;;  %v1053_v54 = vsel %vm384_vm1, %v1511_v51, 0 }
 0x310   : > { %v1379_v57 = vpop.f32.mrb[15].mxu0 }
 0x315   : > { %v617_v58 = vpop.xlane.xlu0 %616 }
 0x316   : > { %v618_v59 = vsub.f32 %v609_v43, %v617_v58  ;;  %v1510_v43 = vld [vmem:[%s2239_s5] sm:$0xff]  }
 0x317   : > { %v1050_v46 = vsel %vm384_vm1, %v1510_v43, 0 }
 0x318   : > { %v619_v60 = vmul.f32 1.442695, %v618_v59  ;;  %1387 = vmatpush3.bf16.xpose.msra.mxu0 %v1050_v46 }
 0x319   : > { %v682_v63 = vpop.permute.xlu0 %681  ;;  %1388 = vmatprep.subr.bf16.mxu0 %v1775_v0 }
 0x31a   : > { %1512 = vpow2.f32 %v619_v60  ;;  %v687_v2 = vsel %vm568_vm3, %v682_v63, 0 }
 0x31d   : > { %742 = vrot.lane.b32.xlu0 %v1273_v61, %s1777_s27  ;;  %s1672_s27 = scalar_lea.vmem %s2186_s8, 128 }
 0x31e   : > { %p1673_p0 = scmp.ne.s32.totalorder %s2186_s8, %s1672_s27 }
 0x320   : > { %1389 = vmatpush3.bf16.xpose.msra.mxu0 %v1053_v54  ;;  %p1674_p4 = pnand %p1673_p0, %p2269_p2 }
 0x322   : > { %p1675_p8 = pneg %p1674_p4 }
 0x324   : > { %v1513_v62 = vpop.eup %1512 }
 0x325   : > { %v624_v1 = vpack.c.bf16 %v1513_v62, %v1513_v62  ;;  %v621_v33 = vsel %vm568_vm3, %v1513_v62, 0.0 }
 0x327   : > { %1347 = vmatmul.mubr.msk.bf16.vlgmr.msra.gmra.mrb[8].mxu1 %vm568_vm3, %v624_v1 }
 0x328   : > { %1351 = vmatpush3.bf16.xpose.msra.mxu1 %v687_v2  ;;  %1352 = vmatprep.mubr.msk.bf16.mxu1 %vm1776_vm0, %v1775_v0 }
 0x329   : > { %1356 = vmatprep.subr.bf16.mxu1 %v1775_v0 }
 0x32f   : > { %1353 = vmatmul.mubr.msk.bf16.vlgmr.msra.gmra.mrb[12].mxu1 %vm568_vm3, %v677_v36 }
 0x330   : > { %1358 = vmatprep.mubr.msk.bf16.mxu1 %vm1776_vm0, %v1775_v0 }
 0x394   : > { %v850_v3 = vpop.xlane.xlu0 %849 }
 0x395   : > { %v851_v4 = vsub.f32 %v842_v48, %v850_v3 }
 0x397   : > { %v852_v16 = vmul.f32 1.442695, %v851_v4 }
 0x398   : > { %v743_v5 = vpop.permute.xlu0 %742 }
 0x399   : > { %v748_v6 = vsel %vm628_vm4, %v743_v5, 0  ;;  %1514 = vpow2.f32 %v852_v16 }
 0x39a   : > { %1357 = vmatpush3.bf16.msra.mxu1 %v748_v6 }
 0x39b   : > { %1368 = vmatprep.subr.bf16.mxu1 %v1775_v0 }
 0x39c   : > { %v966_v19 = vpop.xlane.xlu1 %965 }
 0x39d   : > { %v967_v20 = vsub.f32 %v958_v53, %v966_v19 }
 0x39f   : > { %v968_v23 = vmul.f32 1.442695, %v967_v20 }
 0x3a3   : > { %v1515_v17 = vpop.eup %1514 }
 0x3a4   : > { %v854_v18 = vsel %vm568_vm3, %v1515_v17, 0.0  ;;  %v857_v34 = vpack.c.bf16 %v1515_v17, %v1515_v17 }
 0x3fa   : > { %v666_v7 = vpop.f32.mrb[8].mxu1 }
 0x3fb   : > { %v1348_v8 = vpop.f32.mrb[9].mxu1 }
 0x3fc   : > { %v669_v9 = vpop.f32.mrb[10].mxu1 }
 0x3fd   : > { %v1349_v10 = vpop.f32.mrb[11].mxu1 }
 0x402   : > { %v723_v11 = vpop.f32.mrb[12].mxu1 }
 0x403   : > { %v1354_v12 = vpop.f32.mrb[13].mxu1  ;;  %v729_v13 = vsel %vm568_vm3, %v723_v11, -inf }
 0x404   : > { %v726_v14 = vpop.f32.mrb[14].mxu1  ;;  %730 = vmax.xlane.f32.xlu1 %v729_v13 }
 0x405   : > { %v1355_v15 = vpop.f32.mrb[15].mxu1 }
 0x415   : > { %858 = vrot.lane.b32.xlu1 %v1273_v61, %s1778_s29  ;;  %s1676_s29 = sshll.u32 %s1783_s24, 4  ;;  %s1677_s29 = int_to_ptr.vmem [resolvable:$false] %s1676_s29 }
 0x416   : > { %p1679_p1 = scmp.lt.s32.totalorder %s2186_s8, %s1677_s29 }
 0x419   : > { %974 = vrot.lane.b32.xlu1 %v1273_v61, %s1779_s21  ;;  %s1678_s21 = scalar_lea.vmem %s1677_s29, 256 }
 0x41a   : > { %p1680_p13 = scmp.lt.s32.totalorder %s1678_s21, %s1672_s27 }
 0x41c   : > { %p1681_p3 = por %p1680_p13, %p1679_p1 }
 0x41e   : > { %p1682_p5 = pnand %p1681_p3, %p1675_p8 }
 0x43d   : > { %855 = vadd.xlane.f32.xlu1 %v854_v18 }
 0x491   : > { %v731_v21 = vpop.xlane.xlu1 %730 }
 0x492   : > { %v732_v22 = vsub.f32 %v723_v11, %v731_v21 }
 0x494   : > { %v733_v24 = vmul.f32 1.442695, %v732_v22 }
 0x495   : > { %v859_v26 = vpop.permute.xlu1 %858 }
 0x496   : > { %1516 = vpow2.f32 %v733_v24  ;;  %v864_v30 = vsel %vm628_vm4, %v859_v26, 0 }
 0x497   : > { %1518 = vpow2.f32 %v968_v23 }
 0x499   : > { %v975_v32 = vpop.permute.xlu1 %974 }
 0x49a   : > { %v980_v35 = vsel %vm628_vm4, %v975_v32, 0 }
 0x4a0   : > { %v1517_v25 = vpop.eup %1516 }
 0x4a1   : > { %v735_v27 = vsel %vm568_vm3, %v1517_v25, 0.0  ;;  %v738_v28 = vpack.c.bf16 %v1517_v25, %v1517_v25  ;;  %v1519_v29 = vpop.eup %1518 }
 0x4a2   : > { %736 = vadd.xlane.f32.xlu0 %v735_v27  ;;  %v970_v31 = vsel %vm568_vm3, %v1519_v29, 0.0  ;;  %v973_v36 = vpack.c.bf16 %v1519_v29, %v1519_v29 }
 0x4a3   : > { %1359 = vmatmul.mubr.msk.bf16.vlgmr.msra.gmra.mrb[16].mxu1 %vm568_vm3, %v738_v28 }
 0x4a4   : > { %1369 = vmatpush3.bf16.msra.mxu1 %v864_v30  ;;  %1370 = vmatprep.mubr.msk.bf16.mxu1 %vm1776_vm0, %v1775_v0 }
 0x4a5   : > { %1380 = vmatprep.subr.bf16.mxu1 %v1775_v0 }
 0x4a6   : > { %971 = vadd.xlane.f32.xlu0 %v970_v31 }
 0x4aa   : > { %622 = vadd.xlane.f32.xlu0 %v621_v33 }
 0x4ab   : > { %1371 = vmatmul.mubr.msk.bf16.vlgmr.msra.gmra.mrb[20].mxu1 %vm568_vm3, %v857_v34 }
 0x4ac   : > { %1381 = vmatpush3.bf16.msra.mxu1 %v980_v35  ;;  %1382 = vmatprep.mubr.msk.bf16.mxu1 %vm1776_vm0, %v1775_v0 }
 0x4b3   : > { %1383 = vmatmul.mubr.msk.bf16.vlgmr.msra.gmra.mrb[24].mxu1 %vm568_vm3, %v973_v36 }
 0x4ca   : > { %v856_v42 = vpop.xlane.xlu1 %855 }
 0x52f   : > { %v737_v37 = vpop.xlane.xlu0 %736 }
 0x533   : > { %v972_v38 = vpop.xlane.xlu0 %971 }
 0x537   : > { %v623_v39 = vpop.xlane.xlu0 %622 }
 0x538   : > { %1520 = vrcp.f32 %v623_v39 }
 0x539   : > { %1522 = vrcp.f32 %v737_v37 }
 0x53a   : > { %1524 = vrcp.f32 %v856_v42 }
 0x53b   : > { %1526 = vrcp.f32 %v972_v38 }
 0x542   : > { %v1521_v40 = vpop.eup %1520 }
 0x543   : > { %v673_v41 = vmul.f32 %v1521_v40, %v666_v7  ;;  %v1523_v44 = vpop.eup %1522 }
 0x544   : > { %v1525_v52 = vpop.eup %1524 }
 0x545   : > { %674 = vst.msk [vmem:[#allocation4] sm:$0xff] %vm568_vm3, %v673_v41  ;;  %v1527_v0 = vpop.eup %1526 }
 0x576   : > { %v784_v45 = vpop.f32.mrb[16].mxu1 }
 0x577   : > { %v791_v47 = vmul.f32 %v1523_v44, %v784_v45  ;;  %v1360_v48 = vpop.f32.mrb[17].mxu1 }
 0x578   : > { %v787_v49 = vpop.f32.mrb[18].mxu1 }
 0x579   : > { %v1361_v50 = vpop.f32.mrb[19].mxu1  ;;  %793 = vrot.lane.b32.xlu1 %v791_v47, %s1780_s2 }
 0x57e   : > { %v900_v53 = vpop.f32.mrb[20].mxu1 }
 0x57f   : > { %v907_v55 = vmul.f32 %v1525_v52, %v900_v53  ;;  %v1372_v56 = vpop.f32.mrb[21].mxu1 }
 0x580   : > { %v903_v57 = vpop.f32.mrb[22].mxu1 }
 0x581   : > { %v1373_v58 = vpop.f32.mrb[23].mxu1  ;;  %909 = vrot.lane.b32.xlu0 %v907_v55, %s1781_s14 }
 0x586   : > { %v1016_v59 = vpop.f32.mrb[24].mxu1 }
 0x587   : > { %v1023_v60 = vmul.f32 %v1527_v0, %v1016_v59  ;;  %v1384_v61 = vpop.f32.mrb[25].mxu1 }
 0x588   : > { %v1019_v62 = vpop.f32.mrb[26].mxu1 }
 0x589   : > { %1025 = vrot.lane.b32.xlu1 %v1023_v60, %s1782_s28  ;;  %v1385_v63 = vpop.f32.mrb[27].mxu1 }
 0x5eb   : > { %v794_v1 = vpop.permute.xlu1 %793 }
 0x5ec   : > { %797 = vst.msk [vmem:[#allocation4] sm:$0xff] %vm796_vm5, %v794_v1 }
 0x5f3   : > { %v910_v2 = vpop.permute.xlu0 %909 }
 0x5f4   : > { %913 = vst.msk [vmem:[#allocation4] sm:$0xff] %vm912_vm6, %v910_v2 }
 0x5fb   : > { %v1026_v3 = vpop.permute.xlu1 %1025 }
 0x5fc   : > { %1029 = vst.msk [vmem:[#allocation4] sm:$0xff] %vm1028_vm7, %v1026_v3 }
 0x603   : > { %v1030_v4 = vld [vmem:[#allocation4] sm:$0xff] }
 0x604   : > { %v1031_v5 = vpack.c.bf16 %v1030_v4, %v1030_v4 }
 0x606   : > { %1391 = vmatmul.mubr.msk.bf16.vlgmr.msra.gmra.mrb[16].mxu0 %vm384_vm1, %v1031_v5 }
 0x6d9   : > { %v1089_v6 = vpop.f32.mrb[16].mxu0 }
 0x6da   : > { %1095 = vst.msk [vmem:[%s363_s3] sm:$0xff] %vm384_vm1, %v1089_v6  ;;  %v1392_v7 = vpop.f32.mrb[17].mxu0 }
 0x6db   : > { %v1092_v8 = vpop.f32.mrb[18].mxu0 }
 0x6dc   : > { %1685 = shalt.err (!%p1682_p5)
}
 0x6dd   : > { %s1686_s18 = scalar_lea.hbm %s2184_s7, 128  ;;  %s1690_s2 = scalar_lea.hbm %s2240_s6, 256 }
 0x6de   : > { %p1687_p6 = scmp.ne.s32.totalorder %s2184_s7, %s1686_s18  ;;  %p1691_p12 = scmp.lt.u32.totalorder %s2184_s7, %s2240_s6 }
 0x6df   : > { %p1692_p11 = scmp.lt.u32.totalorder %s1690_s2, %s1686_s18  ;;  %p1694_p0 = scmp.lt.u32.totalorder %s1686_s18, %s2184_s7 }
 0x6e0   : > { %p1688_p10 = pnand %p1687_p6, %p2269_p2 }
 0x6e1   : > { %p1693_p9 = por %p1692_p11, %p1691_p12 }
 0x6e2   : > { %p1689_p7 = pneg %p1688_p10 }
 0x6e3   : > { %p1695_p4 = por %p1694_p0, %p1693_p9 }
 0x6e5   : > { %p1696_p8 = pnand %p1695_p4, %p1689_p7 }
 0x6e7   : > { %1699 = shalt.err (!%p1696_p8)
}
 0x6e8   : > { %1410 = dma.vmem_to_hbm [thread:$0]  (%p2269_p2), %s2186_s8, 128, %s2184_s7, %s1097_s20   ;;  %v1393_v9 = vpop.f32.mrb[19].mxu0 }
 0x6e9 PF: > { %s2270_s14 = sld [smem:[#allocation20_spill]]  ;;  %s2271_s28 = sld [smem:[#allocation21_spill]] }
 0x6ea   : > { %p2273_p13 = scmp.ge.s32.totalorder %s1766_s26, 2 }
 0x6ef   : > { %s1123_s11 = sand.u32 1, %s2270_s14   ;;  %p2272_p1 = scmp.ne.s32.totalorder %s2271_s28, 0 }
 0x6f0   : > { %s1124_s17 = scalar_lea.sflag [#allocation7], %s1123_s11 }
 0x6f1   : > { %p1430_p3 = pnand %p2273_p13, %p2272_p1 }
 0x6f3   : > { %1741 = dma.done.wait (!%p1430_p3), %s1124_s17, 128  }
 0x6f4   : > { %1743 = vsyncadd (!%p1430_p3), %s1124_s17, 4294967168  ;;  %s26_s26 = sadd.s32 1, %s1766_s26   ;;  %s2274_s21 = smov %s1750_s22 }
 0x6f5   : > { %p23_p5 = scmp.ge.s32.totalorder %s26_s26, 4   ;;  %s2275_s22 = smov %s1754_s23 }
 0x6f6   : > { %s2276_s23 = smov %s1989_s15  ;;  %s2277_s24 = smov %s1762_s25 }
 0x6f7   : > { %s2278_s25 = smov %s2280_s10  ;;  %25 = sbr.rel (!%p23_p5) target bundleno = 13 (0xd), region = 118 }
 0x6fe   :  { %1129 = vsyncpa [#allocation6], 1 }
 0x6ff   :  { %1131 = vsyncpa [#allocation6 + $0x1], 1 }
 0x700   :  { %1132 = vsyncpa [#allocation9], 1 }
 0x701   :  { %1134 = vsyncpa [#allocation9 + $0x1], 1 }
 0x702   :  { %1135 = vsyncpa [#allocation12], 1 }
 0x703   :  { %1136 = vsyncpa [#allocation7], 1 }
 0x704   :  { %1138 = vsyncpa [#allocation7 + $0x1], 1 }

</bundles_post_ra>
